<compile_context>
chip_gen: v7x
topology: tpu7x:2x2x1
jax: 0.10.0
libtpu: 0.0.40
codegen_flags: <defaults>
</compile_context>

<pallas_src>
import functools

import jax
import jax.numpy as jnp
from jax import lax
from jax.experimental import pallas as pl
from jax.experimental.pallas import tpu as pltpu


def _round_up(x, m):
    return ((x + m - 1) // m) * m


def _vmem_limit_bytes():
    """Per-generation scoped VMEM limit (~3/4 of physical, capped at 96 MiB)."""
    try:
        cap = int(pltpu.get_tpu_info().vmem_capacity_bytes)
        return min((cap * 3) // 4, 96 * 1024 * 1024)
    except Exception:
        return 32 * 1024 * 1024  # conservative fallback, safe on every generation


def _pick_row_block(nc, max_rows):
    """Row (sublane) block: multiple of 8 (or full dim when nc < 8), <= nc,
    <= max_rows; split into >= 2 tiles when nc >= 16 so both v7x TCs get work."""
    if nc <= 8:
        return nc                                   # block dim == full array dim
    r = max(8, (min(nc, max_rows) // 8) * 8)        # multiple of 8, <= nc
    if nc >= 16:
        half8 = ((-(-nc // 2) + 7) // 8) * 8        # ~half, rounded up to 8
        r = min(r, half8)
    return r


# ---------------------------------------------------------------------------
# Single-pass kernel: a block of rows with the entire HW extent resident.
# ---------------------------------------------------------------------------
def _frn_single_kernel(x_ref, gamma_ref, beta_ref, tao_ref, eps_ref, o_ref, *, inv_hw):
    # x_ref/o_ref: (Rb, HW)   gamma/beta/tao: (Rb, 1) VMEM   eps: (1, 1) SMEM (=|eps|)
    x = x_ref[...]
    ssq = jnp.sum(x * x, axis=-1, keepdims=True)            # (Rb, 1)  XLU reduce
    mean = ssq * inv_hw + eps_ref[0, 0]
    scale = gamma_ref[...] * lax.rsqrt(mean)                 # rsqrt -> EUP
    # Re-read x_ref for the apply: rematerializing the VMEM load is nearly free
    # and keeps vreg pressure low for large HW blocks.
    o_ref[...] = jnp.maximum(x_ref[...] * scale + beta_ref[...], tao_ref[...])


# ---------------------------------------------------------------------------
# Two-pass kernels: (1) sum of squares over HW tiles, (2) tiled apply.
# ---------------------------------------------------------------------------
def _frn_sumsq_kernel(x_ref, ssq_ref, *, tile_hw, hw):
    # grid = (row_tiles, hw_tiles); ssq block revisited across the hw axis.
    t = pl.program_id(1)

    @pl.when(t == 0)
    def _():
        ssq_ref[...] = jnp.zeros_like(ssq_ref)

    x = x_ref[...]                                           # (Rb, tile_hw)
    if hw % tile_hw != 0:
        # Mask lanes past the true HW extent in the (partial) last tile; padded
        # reads are unspecified, so zero them before they enter the sum.
        lane = lax.broadcasted_iota(jnp.int32, x.shape, 1)
        x = jnp.where(t * tile_hw + lane < hw, x, 0.0)
    ssq_ref[...] += jnp.sum(x * x, axis=-1, keepdims=True)   # (Rb, 1)


def _frn_apply_kernel(ssq_ref, gamma_ref, beta_ref, tao_ref, eps_ref, x_ref, o_ref,
                      *, inv_hw):
    # Per-tile recompute of the (Rb,1) scale is a tiny EUP op; the small operands
    # are revisited from VMEM.  Out-of-bounds lanes of a partial tile may compute
    # garbage but their stores are masked out.
    mean = ssq_ref[...] * inv_hw + eps_ref[0, 0]
    scale = gamma_ref[...] * lax.rsqrt(mean)
    o_ref[...] = jnp.maximum(x_ref[...] * scale + beta_ref[...], tao_ref[...])


# ---------------------------------------------------------------------------
# Wrapper
# ---------------------------------------------------------------------------
def frn_forward(x, gamma, beta, tao, eps, *, force_two_pass=False, tile_hw=None):
    """FilterResponseNormalization forward.  x: (N, C, H, W) float32."""
    N, C, H, W = x.shape
    NC, HW = N * C, H * W
    inv_hw = 1.0 / HW

    # Free reshape to a sublane-dense 2D layout: rows = (n, c), lanes = HW.
    x2 = x.reshape(NC, HW)

    # Tiny per-row parameter vectors (NC * 4 bytes each).
    def per_row(p):
        p = jnp.asarray(p, jnp.float32).reshape(1, C)
        return jnp.broadcast_to(p, (N, C)).reshape(NC, 1)

    gamma_r, beta_r, tao_r = per_row(gamma), per_row(beta), per_row(tao)
    # eps is a learnable scalar -> keep it as an SMEM operand; |.| taken once here.
    abs_eps = jnp.abs(jnp.asarray(eps, jnp.float32)).reshape(1, 1)

    vmem_limit = _vmem_limit_bytes()
    single_budget = vmem_limit // 6      # block bytes; ~4x for dbl-buffered in+out
    two_pass_tile_budget = vmem_limit // 12
    lanes = _round_up(HW, 128)           # physical lane footprint per row

    use_single = (not force_two_pass) and (8 * lanes * 4 <= single_budget)

    if use_single:
        max_rows = max(8, (single_budget // (lanes * 4)) // 8 * 8)
        Rb = _pick_row_block(NC, max_rows)
        grid_r = pl.cdiv(NC, Rb)

        out = pl.pallas_call(
            functools.partial(_frn_single_kernel, inv_hw=inv_hw),
            out_shape=jax.ShapeDtypeStruct((NC, HW), jnp.float32),
            grid=(grid_r,),
            in_specs=[
                pl.BlockSpec((Rb, HW), lambda r: (r, 0)),      # full HW: no wrapper pad
                pl.BlockSpec((Rb, 1), lambda r: (r, 0)),
                pl.BlockSpec((Rb, 1), lambda r: (r, 0)),
                pl.BlockSpec((Rb, 1), lambda r: (r, 0)),
                pl.BlockSpec((1, 1), lambda r: (0, 0),
                             memory_space=pltpu.MemorySpace.SMEM),
            ],
            out_specs=pl.BlockSpec((Rb, HW), lambda r: (r, 0)),
            compiler_params=pltpu.CompilerParams(
                dimension_semantics=("parallel",),
                vmem_limit_bytes=vmem_limit),
            cost_estimate=pl.CostEstimate(
                flops=5 * NC * HW,
                transcendentals=NC,
                bytes_accessed=2 * NC * HW * 4),
        )(x2, gamma_r, beta_r, tao_r, abs_eps)
        return out.reshape(N, C, H, W)

    # ---- two-pass tiled path: scales to arbitrary H*W without whole-row residency
    Rb = _pick_row_block(NC, max_rows=256)
    if tile_hw is None:
        if HW <= 128:
            tile_hw = HW                                       # full dim block
        else:
            t = max(128, (two_pass_tile_budget // (Rb * 4)) // 128 * 128)
            tile_hw = min((HW // 128) * 128, t)
    assert tile_hw == HW or (tile_hw % 128 == 0 and tile_hw <= HW)
    n_t = pl.cdiv(HW, tile_hw)
    grid_r = pl.cdiv(NC, Rb)

    # Pass 1: per-row sum of squares, accumulated over HW tiles (no padding; the
    # kernel masks the ragged tail lanes itself).
    ssq = pl.pallas_call(
        functools.partial(_frn_sumsq_kernel, tile_hw=tile_hw, hw=HW),
        out_shape=jax.ShapeDtypeStruct((NC, 1), jnp.float32),
        grid=(grid_r, n_t),
        in_specs=[pl.BlockSpec((Rb, tile_hw), lambda r, t: (r, t))],
        out_specs=pl.BlockSpec((Rb, 1), lambda r, t: (r, 0)),
        compiler_params=pltpu.CompilerParams(
            dimension_semantics=("parallel", "arbitrary"),
            vmem_limit_bytes=vmem_limit),
        cost_estimate=pl.CostEstimate(
            flops=2 * NC * HW,
            transcendentals=0,
            bytes_accessed=NC * HW * 4 + NC * 4),
    )(x2)

    # Pass 2: tiled normalize + affine + threshold (pure elementwise per tile).
    out = pl.pallas_call(
        functools.partial(_frn_apply_kernel, inv_hw=inv_hw),
        out_shape=jax.ShapeDtypeStruct((NC, HW), jnp.float32),
        grid=(grid_r, n_t),
        in_specs=[
            pl.BlockSpec((Rb, 1), lambda r, t: (r, 0)),
            pl.BlockSpec((Rb, 1), lambda r, t: (r, 0)),
            pl.BlockSpec((Rb, 1), lambda r, t: (r, 0)),
            pl.BlockSpec((Rb, 1), lambda r, t: (r, 0)),
            pl.BlockSpec((1, 1), lambda r, t: (0, 0),
                         memory_space=pltpu.MemorySpace.SMEM),
            pl.BlockSpec((Rb, tile_hw), lambda r, t: (r, t)),
        ],
        out_specs=pl.BlockSpec((Rb, tile_hw), lambda r, t: (r, t)),
        compiler_params=pltpu.CompilerParams(
            dimension_semantics=("parallel", "parallel"),
            vmem_limit_bytes=vmem_limit),
        cost_estimate=pl.CostEstimate(
            flops=3 * NC * HW,
            transcendentals=NC,
            bytes_accessed=2 * NC * HW * 4),
    )(ssq, gamma_r, beta_r, tao_r, abs_eps, x2)

    return out.reshape(N, C, H, W)


# ---------------------------------------------------------------------------
# Pure-JAX reference mirroring the PyTorch module.
# ---------------------------------------------------------------------------
def reference_forward(x, gamma, beta, tao, eps):
    C = x.shape[1]
    mean = jnp.mean(jnp.square(x), axis=(2, 3), keepdims=True) + jnp.abs(eps)
    norm = x * lax.rsqrt(mean)
    shift = norm * gamma.reshape(1, C, 1, 1) + beta.reshape(1, C, 1, 1)
    return jnp.maximum(shift, tao.reshape(1, C, 1, 1))


if __name__ == "__main__":
    key = jax.random.PRNGKey(0)
    k1, k2, k3, k4, k5, k6 = jax.random.split(key, 6)

    # Case 1: H*W = 256 (multiple of 128), random params.
    N, C, H, W = 2, 4, 16, 16
    x = jax.random.normal(k1, (N, C, H, W), dtype=jnp.float32)
    gamma = 1.0 + 0.5 * jax.random.normal(k2, (C,), jnp.float32)
    beta = 0.1 * jax.random.normal(k3, (C,), jnp.float32)
    tao = 0.1 * jax.random.normal(k4, (C,), jnp.float32)
    eps = jnp.float32(1e-6)

    ref = reference_forward(x, gamma, beta, tao, eps)
    out_single = jax.block_until_ready(frn_forward(x, gamma, beta, tao, eps))
    assert out_single.shape == (N, C, H, W)
    assert jnp.allclose(out_single, ref, atol=1e-5, rtol=1e-5), "single-pass mismatch"

    # Same inputs through the tiled two-pass path (2 HW tiles -> accumulator).
    out_two = jax.block_until_ready(
        frn_forward(x, gamma, beta, tao, eps, force_two_pass=True, tile_hw=128))
    assert jnp.allclose(out_two, ref, atol=1e-5, rtol=1e-5), "two-pass mismatch"

    # Case 2: H*W = 100 (NOT a multiple of 128) -> ragged lane tail handled
    # in-kernel (no wrapper pad/slice); module-default params.
    N2, C2, H2, W2 = 2, 8, 10, 10
    x2 = jax.random.normal(k5, (N2, C2, H2, W2), dtype=jnp.float32)
    gamma2 = jnp.ones((C2,), jnp.float32)
    beta2 = jnp.zeros((C2,), jnp.float32)
    tao2 = jnp.zeros((C2,), jnp.float32)
    ref2 = reference_forward(x2, gamma2, beta2, tao2, eps)
    out2 = jax.block_until_ready(frn_forward(x2, gamma2, beta2, tao2, eps))
    assert jnp.allclose(out2, ref2, atol=1e-5, rtol=1e-5), "ragged-HW mismatch"

    # Case 3: two-pass path with H*W = 300 (partial last tile -> iota masking).
    N3, C3, H3, W3 = 1, 4, 10, 30
    x3 = jax.random.normal(k6, (N3, C3, H3, W3), dtype=jnp.float32)
    gamma3 = 1.0 + 0.5 * jax.random.normal(k2, (C3,), jnp.float32)
    beta3 = 0.1 * jax.random.normal(k3, (C3,), jnp.float32)
    tao3 = 0.1 * jax.random.normal(k4, (C3,), jnp.float32)
    ref3 = reference_forward(x3, gamma3, beta3, tao3, eps)
    out3 = jax.block_until_ready(
        frn_forward(x3, gamma3, beta3, tao3, eps, force_two_pass=True, tile_hw=128))
    assert jnp.allclose(out3, ref3, atol=1e-5, rtol=1e-5), "masked-tail mismatch"

    print("KERNEL_OK")
</pallas_src>

<mosaic_0001>
module attributes {stable_mosaic.version = 11 : i64} {
  func.func @_frn_single_kernel(%arg0: i32, %arg1: memref<8x256xf32, #tpu.memory_space<vmem>>, %arg2: memref<8x1xf32, #tpu.memory_space<vmem>>, %arg3: memref<8x1xf32, #tpu.memory_space<vmem>>, %arg4: memref<8x1xf32, #tpu.memory_space<vmem>>, %arg5: memref<1x1xf32, #tpu.memory_space<smem>>, %arg6: memref<8x256xf32, #tpu.memory_space<vmem>>) attributes {dimension_semantics = [#tpu.dimension_semantics<parallel>], iteration_bounds = array<i64: 1>, scalar_prefetch = 0 : i64, scratch_operands = 0 : i64, tpu.core_type = #tpu.core_type<tc>, window_params = [{transform_indices = @transform_0, window_bounds = array<i64: 8, 256>}, {transform_indices = @transform_1, window_bounds = array<i64: 8, 1>}, {transform_indices = @transform_2, window_bounds = array<i64: 8, 1>}, {transform_indices = @transform_3, window_bounds = array<i64: 8, 1>}, {transform_indices = @transform_4, window_bounds = array<i64: 1, 1>}, {transform_indices = @transform_5, window_bounds = array<i64: 8, 256>}]} {
    %c0 = arith.constant 0 : index
    %c0_0 = arith.constant 0 : index
    %0 = vector.load %arg1[%c0, %c0_0] : memref<8x256xf32, #tpu.memory_space<vmem>>, vector<8x256xf32>
    %1 = arith.mulf %0, %0 : vector<8x256xf32>
    %cst = arith.constant dense<0.000000e+00> : vector<8xf32>
    %2 = vector.multi_reduction <add>, %1, %cst [1] : vector<8x256xf32> to vector<8xf32>
    %3 = vector.shape_cast %2 : vector<8xf32> to vector<8x1xf32>
    %cst_1 = arith.constant 3.906250e-03 : f32
    %4 = vector.broadcast %cst_1 : f32 to vector<8x1xf32>
    %5 = arith.mulf %3, %4 : vector<8x1xf32>
    %c0_2 = arith.constant 0 : index
    %c0_3 = arith.constant 0 : index
    %6 = memref.load %arg5[%c0_2, %c0_3] : memref<1x1xf32, #tpu.memory_space<smem>>
    %7 = vector.broadcast %6 : f32 to vector<8x1xf32>
    %8 = arith.addf %5, %7 : vector<8x1xf32>
    %c0_4 = arith.constant 0 : index
    %c0_5 = arith.constant 0 : index
    %9 = vector.load %arg2[%c0_4, %c0_5] : memref<8x1xf32, #tpu.memory_space<vmem>>, vector<8x1xf32>
    %10 = math.rsqrt %8 : vector<8x1xf32>
    %11 = arith.mulf %9, %10 : vector<8x1xf32>
    %c0_6 = arith.constant 0 : index
    %c0_7 = arith.constant 0 : index
    %12 = vector.load %arg1[%c0_6, %c0_7] : memref<8x256xf32, #tpu.memory_space<vmem>>, vector<8x256xf32>
    %13 = vector.broadcast %11 : vector<8x1xf32> to vector<8x256xf32>
    %14 = arith.mulf %12, %13 : vector<8x256xf32>
    %c0_8 = arith.constant 0 : index
    %c0_9 = arith.constant 0 : index
    %15 = vector.load %arg3[%c0_8, %c0_9] : memref<8x1xf32, #tpu.memory_space<vmem>>, vector<8x1xf32>
    %16 = vector.broadcast %15 : vector<8x1xf32> to vector<8x256xf32>
    %17 = arith.addf %14, %16 : vector<8x256xf32>
    %c0_10 = arith.constant 0 : index
    %c0_11 = arith.constant 0 : index
    %18 = vector.load %arg4[%c0_10, %c0_11] : memref<8x1xf32, #tpu.memory_space<vmem>>, vector<8x1xf32>
    %19 = vector.broadcast %18 : vector<8x1xf32> to vector<8x256xf32>
    %20 = arith.maximumf %17, %19 : vector<8x256xf32>
    %c0_12 = arith.constant 0 : index
    %c0_13 = arith.constant 0 : index
    %21 = vector.load %arg6[%c0_12, %c0_13] : memref<8x256xf32, #tpu.memory_space<vmem>>, vector<8x256xf32>
    tpu.vector_store %arg6[%c0_12, %c0_13], %20 {strides = array<i32>} : memref<8x256xf32, #tpu.memory_space<vmem>>, vector<8x256xf32>,
    return
  }
  func.func @transform_0(%arg0: i32) -> (i32, i32) {
    %c0_i32 = arith.constant 0 : i32
    %c0_i32_0 = arith.constant 0 : i32
    return %arg0, %c0_i32 : i32, i32
  }
  func.func @transform_1(%arg0: i32) -> (i32, i32) {
    %c0_i32 = arith.constant 0 : i32
    %c0_i32_0 = arith.constant 0 : i32
    return %arg0, %c0_i32 : i32, i32
  }
  func.func @transform_2(%arg0: i32) -> (i32, i32) {
    %c0_i32 = arith.constant 0 : i32
    %c0_i32_0 = arith.constant 0 : i32
    return %arg0, %c0_i32 : i32, i32
  }
  func.func @transform_3(%arg0: i32) -> (i32, i32) {
    %c0_i32 = arith.constant 0 : i32
    %c0_i32_0 = arith.constant 0 : i32
    return %arg0, %c0_i32 : i32, i32
  }
  func.func @transform_4(%arg0: i32) -> (i32, i32) {
    %c0_i32 = arith.constant 0 : i32
    %c0_i32_0 = arith.constant 0 : i32
    %c0_i32_1 = arith.constant 0 : i32
    return %c0_i32, %c0_i32_0 : i32, i32
  }
  func.func @transform_5(%arg0: i32) -> (i32, i32) {
    %c0_i32 = arith.constant 0 : i32
    %c0_i32_0 = arith.constant 0 : i32
    return %arg0, %c0_i32 : i32, i32
  }
}

</mosaic_0001>

<bundles_post_ra>
// kernel: tpu_custom_call.1
= control target key start
LH: loop header
LB: loop body
LE: loop exit
PB: predicated region body
PF: predicated region fallthrough
CT: control target
= control target key end

     0   :  { %s167_s0 = inlined_call_operand.vmem [shape: f32[8,256], index: 0, kind: input, shape index: {}]   ;;  %s168_s1 = inlined_call_operand.vmem [shape: f32[8,1], index: 1, kind: input, shape index: {}]   ;;  %s169_s2 = inlined_call_operand.vmem [shape: f32[8,1], index: 2, kind: input, shape index: {}]   ;;  %s170_s3 = inlined_call_operand.vmem [shape: f32[8,1], index: 3, kind: input, shape index: {}]   ;;  %s171_s4 = inlined_call_operand.<no memory space> [shape: f32[1,1], index: 4, kind: input, shape index: {}]   ;;  %s172_s5 = inlined_call_operand.hbm [shape: f32[8,256], index: 5, kind: output, shape index: {}]  }
   0x1   :  { %v22_v0 = vld [vmem:[%s167_s0] sm:$0xff]  ;;  %v23_v1 = vld [vmem:[%s167_s0 + $0x8] sm:$0xff] }
   0x2   :  { %11 = vsyncpa [#allocation4], 0  ;;  %v24_v2 = vmul.f32 %v22_v0, %v22_v0  ;;  %v25_v3 = vmul.f32 %v23_v1, %v23_v1  ;;  %v43_v5 = vld [vmem:[%s169_s2] sm:$0xff]  ;;  %v105_v6 = vmov 0   ;;  %v31_v8 = vstv %s171_s4  ;;  %s106_s2 = smov [#allocation3]  }
   0x3   :  { %78 = vset.pattern.permute.xlu1 %v105_v6  ;;  %77 = vset.pattern.permute.xlu0 %v105_v6  ;;  %v51_v7 = vld [vmem:[%s170_s3] sm:$0xff]  ;;  %s67_s3 = sshll.u32 %s106_s2, 4  ;;  %s68_s3 = int_to_ptr.vmem [resolvable:$true] %s67_s3 }
   0x4   :  { %v26_v4 = vadd.f32 %v25_v3, %v24_v2  ;;  %46 = vperm.xlu1 %78, %v43_v5   ;;  %v33_v12 = vld [vmem:[%s168_s1] sm:$0xff]  ;;  %s81_s4 = scalar_lea.vmem %s68_s3, 256  ;;  %p86_p1 = scmp.lt.s32.totalorder %s68_s3, %s68_s3 }
   0x5   :  { %p82_p0 = scmp.ne.s32.totalorder %s68_s3, %s81_s4  ;;  %p87_p2 = scmp.lt.s32.totalorder %s81_s4, %s81_s4 }
   0x6   :  { %27 = vadd.xlane.f32.xlu0 %v26_v4 }
   0x7   :  { %p88_p3 = por %p87_p2, %p86_p1 }
   0x8   :  { %54 = vperm.xlu1 %78, %v51_v7  }
   0x9   :  { %p89_p4 = pnand %p88_p3, %p82_p0 }
  0x83   :  { %v47_v15 = vpop.permute.xlu1 %46 }
  0x87   :  { %v55_v21 = vpop.permute.xlu1 %54 }
  0x93   :  { %v28_v9 = vpop.xlane.xlu0 %27 }
  0x94   :  { %v29_v10 = vmul.f32 0.00390625, %v28_v9 }
  0x96   :  { %v32_v11 = vadd.f32 %v31_v8, %v29_v10 }
  0x98   :  { %79 = vrsqrt.f32 %v32_v11 }
  0xa2   :  { %v80_v13 = vpop.eup %79 }
  0xa3   :  { %v35_v14 = vmul.f32 %v80_v13, %v33_v12 }
  0xa5   :  { %38 = vperm.xlu0 %77, %v35_v14  }
 0x124   :  { %v39_v16 = vpop.permute.xlu0 %38 }
 0x125   :  { %v41_v17 = vmul.f32 %v39_v16, %v22_v0  ;;  %v42_v18 = vmul.f32 %v39_v16, %v23_v1 }
 0x127   :  { %v49_v19 = vadd.f32 %v47_v15, %v41_v17  ;;  %v50_v20 = vadd.f32 %v47_v15, %v42_v18 }
 0x129   :  { %v57_v22 = vmax.f32 %v49_v19, %v55_v21  ;;  %v58_v23 = vmax.f32 %v50_v20, %v55_v21 }
 0x12b   :  { %59 = vst [vmem:[#allocation3] sm:$0xff] %v57_v22  ;;  %60 = vst [vmem:[#allocation3 + $0x8] sm:$0xff] %v58_v23 }
 0x12c   :  { %92 = shalt.err (!%p89_p4)
}
 0x12d   :  { %s93_s30 = scalar_lea.hbm %s172_s5, 256 }
 0x12e   :  { %p94_p5 = scmp.ne.s32.totalorder %s172_s5, %s93_s30  ;;  %p97_p6 = scmp.lt.u32.totalorder %s93_s30, %s172_s5 }
 0x130   :  { %p99_p7 = pnand %p97_p6, %p94_p5 }
 0x132   :  { %102 = shalt.err (!%p99_p7)
}
 0x133   :  { %70 = dma.vmem_to_hbm [thread:$0]  %s68_s3, 256, %s172_s5, [#allocation4]  }
 0x134   :  { %103 = dma.done.wait [#allocation4], 256  }
 0x135   :  { %104 = vsyncadd [#allocation4], 4294967040 }
 0x136   :  { %74 = vsyncpa [#allocation4], 1 }

</bundles_post_ra>
